<compile_context>
chip_gen: v5e
topology: v5e:2x2
jax: 0.10.0
libtpu: 0.0.40
codegen_flags: <defaults>
</compile_context>

<pallas_src>
import math

import numpy as np
import jax
import jax.numpy as jnp
from jax.experimental import pallas as pl
from jax.experimental.pallas import tpu as pltpu


def token_embed_kernel(x_ref, w0_ref, w1_ref, w2_ref, b_ref, o_ref):
    """One batch element: circular conv1d(k=3) as three accumulated matmuls.

    x_ref : (L, c_in)        one full sequence, channels-last, compute dtype
    wK_ref: (c_in, d_model)  conv tap K (K = 0, 1, 2)
    b_ref : (1, d_model)     f32 bias row
    o_ref : (L, d_model)     lane-dense output tile
    """
    x = x_ref[...]
    seq = x.shape[0]
    # Build the +/-1 circular taps in-kernel (no 3x unfolded array in HBM).
    # Rotate a 32-bit copy (sublane rotation of packed 16-bit data is
    # layout-hostile); the casts are exact and the tile is tiny.
    xf = x.astype(jnp.float32)
    x_prev = pltpu.roll(xf, 1, axis=0).astype(x.dtype)         # row l -> x[l-1]
    x_next = pltpu.roll(xf, seq - 1, axis=0).astype(x.dtype)   # row l -> x[l+1]

    acc = jnp.dot(x_prev, w0_ref[...], preferred_element_type=jnp.float32)
    acc = acc + jnp.dot(x, w1_ref[...], preferred_element_type=jnp.float32)
    acc = acc + jnp.dot(x_next, w2_ref[...], preferred_element_type=jnp.float32)
    o_ref[...] = (acc + b_ref[...]).astype(o_ref.dtype)


def token_embedding(x, weight, bias, *, channels_last=False,
                    compute_dtype=jnp.bfloat16):
    """Informer TokenEmbedding forward (circular Conv1d, kernel=3, pad=1).

    x      : (B, c_in, L)
    weight : (d_model, c_in, 3)   PyTorch Conv1d layout
    bias   : (d_model,)

    Returns (B, d_model, L) when channels_last=False (exact nn.Module layout),
    or (B, L, d_model) when channels_last=True, which skips the final output
    transpose -- use it when the consumer immediately transposes anyway (as
    Informer's DataEmbedding does); it removes a full extra HBM pass over the
    largest tensor in this op.
    """
    B, c_in, L = x.shape
    d_model, _, K = weight.shape
    assert K == 3, "TokenEmbedding uses kernel_size=3"
    cdt = np.dtype(compute_dtype) if compute_dtype is not None else np.dtype(x.dtype)

    # Channels-last input (c_in on the lane axis for the MXU contraction).
    # This transpose is the only wrapper-side data movement: rows*c_in bytes,
    # tiny next to the rows*d_model output.
    xt = jnp.transpose(x, (0, 2, 1)).astype(cdt)                # (B, L, c_in)
    # Per-tap weights: w_taps[k, c, o] = weight[o, c, k]
    w_taps = jnp.transpose(weight, (2, 1, 0)).astype(cdt)       # (3, c_in, d_model)
    b_row = bias.reshape(1, d_model).astype(jnp.float32)

    out_bytes = np.dtype(x.dtype).itemsize
    cd_bytes = cdt.itemsize
    cost = pl.CostEstimate(
        flops=2 * B * L * 3 * c_in * d_model,
        transcendentals=0,
        bytes_accessed=(B * L * c_in * cd_bytes            # input read
                        + 3 * c_in * d_model * cd_bytes    # weights
                        + d_model * 4                      # bias
                        + B * L * d_model * out_bytes))    # output write

    y_bld = pl.pallas_call(
        token_embed_kernel,
        out_shape=jax.ShapeDtypeStruct((B, L, d_model), x.dtype),
        grid_spec=pltpu.PrefetchScalarGridSpec(
            num_scalar_prefetch=0,
            grid=(B,),
            in_specs=[
                pl.BlockSpec((None, L, c_in), lambda b: (b, 0, 0)),
                pl.BlockSpec((c_in, d_model), lambda b: (0, 0)),
                pl.BlockSpec((c_in, d_model), lambda b: (0, 0)),
                pl.BlockSpec((c_in, d_model), lambda b: (0, 0)),
                pl.BlockSpec((1, d_model), lambda b: (0, 0)),
            ],
            out_specs=pl.BlockSpec((None, L, d_model), lambda b: (b, 0, 0)),
        ),
        compiler_params=pltpu.CompilerParams(
            dimension_semantics=("parallel",)),   # batch steps shard across TCs (v7x)
        cost_estimate=cost,
    )(xt, w_taps[0], w_taps[1], w_taps[2], b_row)

    if channels_last:
        return y_bld                                            # (B, L, d_model)
    # Exact nn.Conv1d output layout.  NOTE: this transpose costs a full extra
    # HBM read+write of the output; prefer channels_last=True when the caller
    # transposes right back (Informer does).
    return jnp.transpose(y_bld, (0, 2, 1))                      # (B, d_model, L)


def init_params(key, c_in, d_model, kernel_size=3):
    """Synthetic init matching nn.Conv1d + kaiming_normal_(fan_in, leaky_relu)."""
    kw, kb = jax.random.split(key)
    fan_in = c_in * kernel_size
    gain = math.sqrt(2.0 / (1.0 + 0.01 ** 2))
    std = gain / math.sqrt(fan_in)
    weight = std * jax.random.normal(kw, (d_model, c_in, kernel_size), jnp.float32)
    bound = 1.0 / math.sqrt(fan_in)
    bias = jax.random.uniform(kb, (d_model,), jnp.float32, -bound, bound)
    return weight, bias


def reference(x, weight, bias):
    """Pure-JAX reference: circular-padded conv1d (kernel=3, pad=1), f32 math."""
    x_pad = jnp.concatenate([x[..., -1:], x, x[..., :1]], axis=-1)
    L = x.shape[-1]
    out = jnp.zeros((x.shape[0], weight.shape[0], L), jnp.float32)
    for k in range(3):
        out = out + jnp.einsum('oc,bcl->bol', weight[:, :, k],
                               x_pad[:, :, k:k + L],
                               precision=jax.lax.Precision.HIGHEST)
    return out + bias[None, :, None]


if __name__ == "__main__":
    key = jax.random.PRNGKey(0)
    k1, k2, k3, k4 = jax.random.split(key, 4)

    # -- Test 1: exact nn.Module layout (B, d_model, L), f32 compute ----------
    B, c_in, L, d_model = 2, 4, 16, 32
    x = jax.random.normal(k1, (B, c_in, L), jnp.float32)
    weight, bias = init_params(k2, c_in, d_model)
    y = jax.block_until_ready(
        token_embedding(x, weight, bias, compute_dtype=jnp.float32))
    y_ref = reference(x, weight, bias)
    assert y.shape == (B, d_model, L)
    # 1e-2 comfortably covers MXU f32 multi-pass rounding while any semantic
    # bug (wrong tap direction / weight mapping / layout) would be O(1).
    assert jnp.allclose(y, y_ref, atol=1e-2, rtol=1e-2), "f32 path mismatch"

    # -- Test 2: channels-last fast path + default bf16 compute ---------------
    B2, c2, L2, d2 = 2, 7, 24, 128      # lane-dense d_model, odd c_in
    x2 = jax.random.normal(k3, (B2, c2, L2), jnp.float32)
    w2, b2 = init_params(k4, c2, d2)
    y2 = jax.block_until_ready(token_embedding(x2, w2, b2, channels_last=True))
    # Reference on bf16-rounded inputs (both sides accumulate in f32).
    xq = x2.astype(jnp.bfloat16).astype(jnp.float32)
    wq = w2.astype(jnp.bfloat16).astype(jnp.float32)
    y2_ref = jnp.transpose(reference(xq, wq, b2), (0, 2, 1))    # (B, L, d_model)
    assert y2.shape == (B2, L2, d2)
    assert jnp.allclose(y2, y2_ref, atol=1e-2, rtol=1e-2), "bf16 path mismatch"

    print("KERNEL_OK")
</pallas_src>

<mosaic_0001>
module attributes {stable_mosaic.version = 11 : i64} {
  func.func @token_embed_kernel(%arg0: i32, %arg1: memref<1x16x4xf32, #tpu.memory_space<vmem>>, %arg2: memref<4x32xf32, #tpu.memory_space<vmem>>, %arg3: memref<4x32xf32, #tpu.memory_space<vmem>>, %arg4: memref<4x32xf32, #tpu.memory_space<vmem>>, %arg5: memref<1x32xf32, #tpu.memory_space<vmem>>, %arg6: memref<1x16x32xf32, #tpu.memory_space<vmem>>) attributes {dimension_semantics = [#tpu.dimension_semantics<parallel>], iteration_bounds = array<i64: 2>, scalar_prefetch = 0 : i64, scratch_operands = 0 : i64, tpu.core_type = #tpu.core_type<tc>, window_params = [{transform_indices = @transform_0, window_bounds = array<i64: 1, 16, 4>}, {pipeline_mode = #tpu.pipeline_mode<synchronous>, transform_indices = @transform_1, window_bounds = array<i64: 4, 32>}, {pipeline_mode = #tpu.pipeline_mode<synchronous>, transform_indices = @transform_2, window_bounds = array<i64: 4, 32>}, {pipeline_mode = #tpu.pipeline_mode<synchronous>, transform_indices = @transform_3, window_bounds = array<i64: 4, 32>}, {pipeline_mode = #tpu.pipeline_mode<synchronous>, transform_indices = @transform_4, window_bounds = array<i64: 1, 32>}, {transform_indices = @transform_5, window_bounds = array<i64: 1, 16, 32>}]} {
    %c0 = arith.constant 0 : index
    %c0_0 = arith.constant 0 : index
    %c0_1 = arith.constant 0 : index
    %0 = vector.load %arg1[%c0, %c0_0, %c0_1] : memref<1x16x4xf32, #tpu.memory_space<vmem>>, vector<1x16x4xf32>
    %1 = vector.shape_cast %0 : vector<1x16x4xf32> to vector<16x4xf32>
    %c1_i32 = arith.constant 1 : i32
    %2 = tpu.dynamic_rotate %1 by %c1_i32 dim 0 : vector<16x4xf32>, i32 -> vector<16x4xf32>
    %c15_i32 = arith.constant 15 : i32
    %3 = tpu.dynamic_rotate %1 by %c15_i32 dim 0 : vector<16x4xf32>, i32 -> vector<16x4xf32>
    %c0_2 = arith.constant 0 : index
    %c0_3 = arith.constant 0 : index
    %4 = vector.load %arg2[%c0_2, %c0_3] : memref<4x32xf32, #tpu.memory_space<vmem>>, vector<4x32xf32>
    %cst = arith.constant dense<0.000000e+00> : vector<16x32xf32>
    %5 = tpu.matmul %2, %4, %cst {dimension_numbers = #tpu.dot_dimension_numbers<[1], [0], [0], [1], [0, 0, 1, 1], [], []>} : vector<16x4xf32>, vector<4x32xf32>, vector<16x32xf32> -> vector<16x32xf32>
    %c0_4 = arith.constant 0 : index
    %c0_5 = arith.constant 0 : index
    %6 = vector.load %arg3[%c0_4, %c0_5] : memref<4x32xf32, #tpu.memory_space<vmem>>, vector<4x32xf32>
    %cst_6 = arith.constant dense<0.000000e+00> : vector<16x32xf32>
    %7 = tpu.matmul %1, %6, %cst_6 {dimension_numbers = #tpu.dot_dimension_numbers<[1], [0], [0], [1], [0, 0, 1, 1], [], []>} : vector<16x4xf32>, vector<4x32xf32>, vector<16x32xf32> -> vector<16x32xf32>
    %8 = arith.addf %5, %7 : vector<16x32xf32>
    %c0_7 = arith.constant 0 : index
    %c0_8 = arith.constant 0 : index
    %9 = vector.load %arg4[%c0_7, %c0_8] : memref<4x32xf32, #tpu.memory_space<vmem>>, vector<4x32xf32>
    %cst_9 = arith.constant dense<0.000000e+00> : vector<16x32xf32>
    %10 = tpu.matmul %3, %9, %cst_9 {dimension_numbers = #tpu.dot_dimension_numbers<[1], [0], [0], [1], [0, 0, 1, 1], [], []>} : vector<16x4xf32>, vector<4x32xf32>, vector<16x32xf32> -> vector<16x32xf32>
    %11 = arith.addf %8, %10 : vector<16x32xf32>
    %c0_10 = arith.constant 0 : index
    %c0_11 = arith.constant 0 : index
    %12 = vector.load %arg5[%c0_10, %c0_11] : memref<1x32xf32, #tpu.memory_space<vmem>>, vector<1x32xf32>
    %13 = vector.broadcast %12 : vector<1x32xf32> to vector<16x32xf32>
    %14 = arith.addf %11, %13 : vector<16x32xf32>
    %c0_12 = arith.constant 0 : index
    %c0_13 = arith.constant 0 : index
    %c0_14 = arith.constant 0 : index
    %15 = vector.load %arg6[%c0_12, %c0_13, %c0_14] : memref<1x16x32xf32, #tpu.memory_space<vmem>>, vector<1x16x32xf32>
    %16 = vector.shape_cast %15 : vector<1x16x32xf32> to vector<16x32xf32>
    %17 = vector.shape_cast %14 : vector<16x32xf32> to vector<1x16x32xf32>
    tpu.vector_store %arg6[%c0_12, %c0_13, %c0_14], %17 {strides = array<i32>} : memref<1x16x32xf32, #tpu.memory_space<vmem>>, vector<1x16x32xf32>,
    return
  }
  func.func @transform_0(%arg0: i32) -> (i32, i32, i32) {
    %c0_i32 = arith.constant 0 : i32
    %c0_i32_0 = arith.constant 0 : i32
    %c0_i32_1 = arith.constant 0 : i32
    return %arg0, %c0_i32, %c0_i32_0 : i32, i32, i32
  }
  func.func @transform_1(%arg0: i32) -> (i32, i32) {
    %c0_i32 = arith.constant 0 : i32
    %c0_i32_0 = arith.constant 0 : i32
    %c0_i32_1 = arith.constant 0 : i32
    return %c0_i32, %c0_i32_0 : i32, i32
  }
  func.func @transform_2(%arg0: i32) -> (i32, i32) {
    %c0_i32 = arith.constant 0 : i32
    %c0_i32_0 = arith.constant 0 : i32
    %c0_i32_1 = arith.constant 0 : i32
    return %c0_i32, %c0_i32_0 : i32, i32
  }
  func.func @transform_3(%arg0: i32) -> (i32, i32) {
    %c0_i32 = arith.constant 0 : i32
    %c0_i32_0 = arith.constant 0 : i32
    %c0_i32_1 = arith.constant 0 : i32
    return %c0_i32, %c0_i32_0 : i32, i32
  }
  func.func @transform_4(%arg0: i32) -> (i32, i32) {
    %c0_i32 = arith.constant 0 : i32
    %c0_i32_0 = arith.constant 0 : i32
    %c0_i32_1 = arith.constant 0 : i32
    return %c0_i32, %c0_i32_0 : i32, i32
  }
  func.func @transform_5(%arg0: i32) -> (i32, i32, i32) {
    %c0_i32 = arith.constant 0 : i32
    %c0_i32_0 = arith.constant 0 : i32
    %c0_i32_1 = arith.constant 0 : i32
    return %arg0, %c0_i32, %c0_i32_0 : i32, i32, i32
  }
}

</mosaic_0001>

<bundles_post_ra>
// kernel: tpu_custom_call.1
= control target key start
LH: loop header
LB: loop body
LE: loop exit
PB: predicated region body
PF: predicated region fallthrough
CT: control target
= control target key end

     0   :  { %10 = vsyncpa [#allocation3], 0  ;;  %s686_s0 = inlined_call_operand.vmem [shape: f32[2,16,4], index: 0, kind: input, shape index: {}]   ;;  %s687_s1 = inlined_call_operand.vmem [shape: f32[4,32], index: 1, kind: input, shape index: {}]   ;;  %s688_s2 = inlined_call_operand.vmem [shape: f32[4,32], index: 2, kind: input, shape index: {}]   ;;  %s689_s3 = inlined_call_operand.vmem [shape: f32[4,32], index: 3, kind: input, shape index: {}]   ;;  %s690_s4 = inlined_call_operand.vmem [shape: f32[1,32], index: 4, kind: input, shape index: {}]   ;;  %s691_s5 = inlined_call_operand.hbm [shape: f32[2,16,32], index: 5, kind: output, shape index: {}]  }
   0x1   :  { %12 = vsyncpa [#allocation3 + $0x1], 0  ;;  %s589_s18 = smov 0   ;;  %s591_s19 = smov 0  }
   0x2   :  { %s593_s20 = smov 0   ;;  %s595_s21 = smov 0  }
   0x3 LB: > { %s610_s22 = sadd.s32 4294967295, %s555_s21   ;;  %s427_s23 = sadd.s32 4294967294, %s555_s21   ;;  %s555_s21 = sphi %s595_s21, %s697_s21   ;;  %s551_s20 = sphi %s593_s20, %s696_s20   ;;  %s547_s19 = sphi %s591_s19, %s695_s19   ;;  %s543_s18 = sphi %s589_s18, %s694_s18  }
   0x4   : > { %s614_s24 = sadd.s32 1, %s555_s21   ;;  %s135_s25 = sadd.s32 1, %s551_s20 }
   0x5   : > { %s132_s26 = ssub.s32 %s555_s21, %s614_s24  ;;  %p145_p0 = scmp.ne.s32.totalorder %s551_s20, %s547_s19 }
   0x6   : > { %p133_p1 = scmp.eq.s32.totalorder %s132_s26, 0  ;;  %p146_p2 = scmp.eq.s32.totalorder %s610_s22, 1 }
   0x7   : > { %p151_p3 = scmp.ne.s32.totalorder %s547_s19, %s543_s18  ;;  %p152_p4 = scmp.eq.s32.totalorder %s427_s23, 1 }
   0x8   : > { %s625_s27 = scalar_select %p133_p1, %s551_s20, %s135_s25  }
   0x9   : > { %p627_p5 = por %p146_p2, %p145_p0  ;;  %p631_p6 = por %p152_p4, %p151_p3 }
   0xa   : > { %p430_p7 = scmp.ge.s32.totalorder %s555_s21, 1  ;;  %p190_p8 = scmp.lt.s32.totalorder %s555_s21, 3 }
   0xc   : > { %p191_p9 = pnand %p430_p7, %p190_p8 }
   0xd   : > { %p218_p10 = scmp.lt.s32.totalorder (!%p191_p9), %s610_s22, 1  ;;  %s215_s16 = sand.u32 (!%p191_p9), 1, %s547_s19  }
   0xe   : > { %194 = sbr.rel (%p191_p9) target bundleno = 175 (0xaf), region = 40  ;;  %s431_s17 = sshll.u32 (!%p191_p9), %s215_s16, 4 }
   0xf   : > { %s449_s26 = sshll.u32 (!%p191_p9), %s610_s22, 4  ;;  %s217_s8 = scalar_lea.vmem (!%p191_p9), [#allocation2], %s431_s17 }
  0x10   : > { %s361_s7 = scalar_lea.hbm (!%p191_p9), %s691_s5, %s449_s26  ;;  %s362_s9 = sshll.u32 (!%p191_p9), %s217_s8, 4  ;;  %s363_s9 = int_to_ptr.vmem [resolvable:$true] %s362_s9 }
  0x11   : > { %s364_s10 = sshll.u32 (!%p191_p9), %s361_s7, 4  ;;  %s365_s10 = int_to_ptr.hbm [resolvable:$true] %s364_s10 }
  0x13   : > { %vm246_vm0 = vcmask 1043456   ;;  %v305_v0 = vld [vmem:[%s689_s3] sm:$0xf]  ;;  %v227_v1 = vlaneseq  ;;  %s219_s11 = scalar_select %p218_p10, %s610_s22, 1  ;;  %vm239_vm2 = vcmask 31744   ;;  %vm346_vm4 = vcmask 261120  }
  0x14   : > { %440 = vmatpush.msk.msra.mxu2 %vm246_vm0, %v305_v0  ;;  %v238_v2 = vld [vmem:[%s688_s2] sm:$0xf]  ;;  %s350_s22 = scalar_lea.sflag [#allocation3], %s215_s16 }
  0x15   : > { %v237_v3 = vld [vmem:[%s687_s1] sm:$0xf]  ;;  %v228_v4 = vshrl.u32 %v227_v1, 7  ;;  %434 = vmatpush.msk.msra.mxu0 %vm246_vm0, %v238_v2  ;;  %450 = vmatpush.msk.msra.mxu3 %vm246_vm0, %v238_v2  ;;  %s448_s12 = sshll.u32 %s219_s11, 4  ;;  %s507_s11 = sshra.s32 %s365_s10, 4  ;;  %s508_s11 = int_to_ptr.hbm [resolvable:$true] %s507_s11 }
  0x16   : > { %437 = vmatpush.msk.msra.mxu1 %vm246_vm0, %v237_v3  ;;  %s222_s15 = scalar_lea.vmem %s686_s0, %s448_s12  ;;  %v492_v18 = vld [vmem:[%s690_s4] ss:$0 sm:$0xff]  ;;  %s509_s12 = scalar_lea.hbm %s508_s11, 16 }
  0x17   : > { %v223_v5 = vld [vmem:[%s222_s15] sm:$0xff]  ;;  %v224_v6 = vld [vmem:[%s222_s15 + $0x8] sm:$0xff]  ;;  %vm234_vm1 = vcmp.lt.s32.totalorder %v228_v4, 7  ;;  %vm229_vm3 = vcmp.lt.s32.totalorder %v228_v4, 1  ;;  %p510_p11 = scmp.ne.s32.totalorder %s508_s11, %s509_s12  ;;  %s513_s15 = scalar_lea.hbm %s691_s5, 32 }
  0x18   : > { %v232_v7 = vrot.slane %v223_v5, 1  ;;  %v233_v8 = vrot.slane %v224_v6, 1  ;;  %435 = vmatmul.msk.f32.vlgmr.msra.gmra.mxu0 %vm239_vm2, %v223_v5  ;;  %v225_v9 = vrot.slane %v223_v5, 7  ;;  %v226_v10 = vrot.slane %v224_v6, 7  ;;  %436 = vmatmul.msk.f32.vlgmr.msra.gmra.mxu3 %vm239_vm2, %v224_v6  ;;  %p514_p0 = scmp.lt.s32.totalorder %s508_s11, %s691_s5  ;;  %p515_p1 = scmp.lt.s32.totalorder %s513_s15, %s509_s12 }
  0x19   : > { %p511_p12 = pnand %p510_p11, %p627_p5 }
  0x1a   : > { %v235_v11 = vsel %vm234_vm1, %v232_v7, %v233_v8  ;;  %v231_v12 = vsel %vm229_vm3, %v226_v10, %v225_v9  ;;  %v236_v13 = vsel %vm234_vm1, %v233_v8, %v232_v7  ;;  %v230_v14 = vsel %vm229_vm3, %v225_v9, %v226_v10  ;;  %p516_p2 = por %p515_p1, %p514_p0 }
  0x1b   : > { %441 = vmatmul.msk.f32.vlgmr.msra.gmra.mxu2 %vm239_vm2, %v235_v11  ;;  %438 = vmatmul.msk.f32.vlgmr.msra.gmra.mxu1 %vm239_vm2, %v231_v12  ;;  %p512_p13 = pneg %p511_p12 }
  0x1d   : > { %p517_p3 = pnand %p516_p2, %p512_p13 }
  0x23   : > { %442 = vmatmul.msk.f32.gmra.mxu2 %vm239_vm2, %v236_v13  ;;  %439 = vmatmul.msk.f32.gmra.mxu1 %vm239_vm2, %v230_v14 }
  0x95   : > { %v267_v15 = vpop.f32.mrf.mxu0 }
  0x98   : > { %v299_v16 = vpop.f32.mrf.mxu1 }
  0x99   : > { %v300_v17 = vadd.f32 %v299_v16, %v267_v15 }
  0x9b   : > { %v270_v21 = vpop.f32.mrf.mxu3 }
  0x9e   : > { %v332_v19 = vpop.f32.mrf.mxu2 }
  0x9f   : > { %v338_v20 = vadd.f32 %v332_v19, %v300_v17 }
  0xa0   : > { %v302_v22 = vpop.f32.mrf.mxu1 }
  0xa1   : > { %v344_v23 = vadd.f32 %v492_v18, %v338_v20  ;;  %v303_v24 = vadd.f32 %v302_v22, %v270_v21 }
  0xa3   : > { %347 = vst.msk [vmem:[%s217_s8] sm:$0xff] %vm346_vm4, %v344_v23 }
  0xa6   : > { %v335_v25 = vpop.f32.mrf.mxu2 }
  0xa7   : > { %v339_v26 = vadd.f32 %v335_v25, %v303_v24 }
  0xa9   : > { %v345_v27 = vadd.f32 %v492_v18, %v339_v26 }
  0xab   : > { %348 = vst.msk [vmem:[%s217_s8 + $0x8] sm:$0xff] %vm346_vm4, %v345_v27 }
  0xac   : > { %520 = shalt.err (!%p517_p3)
}
  0xad   : > { %s557_s16 = smov 128   ;;  %s558_s25 = smov 8  }
  0xae   : > { %451 = dma.vmem_to_hbm [thread:$0]  (%p627_p5), %s363_s9, 256, %s365_s10, %s350_s22, %s557_s16, %s557_s16, %s558_s25  }
  0xaf PF: > { %p457_p4 = scmp.ge.s32.totalorder %s555_s21, 2  ;;  %s379_s26 = sand.u32 1, %s543_s18  }
  0xb0   : > { %s380_s30 = scalar_lea.sflag [#allocation3], %s379_s26 }
  0xb1   : > { %p454_p7 = pnand %p457_p4, %p631_p6 }
  0xb3   : > { %p455_p8 = pneg %p454_p7 }
  0xb5   : > { %538 = dma.done.wait (%p455_p8), %s380_s30, 256  }
  0xb6   : > { %540 = vsyncadd (%p455_p8), %s380_s30, 4294967040  ;;  %p15_p9 = scmp.ge.s32.totalorder %s614_s24, 4   ;;  %s694_s18 = smov %s547_s19 }
  0xb7   : > { %s695_s19 = smov %s551_s20  ;;  %s696_s20 = smov %s625_s27 }
  0xb8   : > { %s697_s21 = smov %s614_s24  ;;  %17 = sbr.rel (!%p15_p9) target bundleno = 3 (0x3), region = 75 }
  0xbd   :  { %386 = vsyncpa [#allocation3], 1 }
  0xbe   :  { %388 = vsyncpa [#allocation3 + $0x1], 1 }

</bundles_post_ra>
